<compile_context>
chip_gen: v7x
topology: tpu7x:2x2x1
jax: 0.10.0
libtpu: 0.0.40
codegen_flags: <defaults>
</compile_context>

<pallas_src>
import functools

import jax
import jax.numpy as jnp
from jax.experimental import pallas as pl
from jax.experimental.pallas import tpu as pltpu

GAMMA = 2.0          # realised as a VPU square of sigmoid(u); do not change blindly
SMOOTH_NR = 1e-5
SMOOTH_DR = 1e-5


def _log_sigmoid(z):
    # numerically stable log(sigmoid(z)) = min(z,0) - log(1 + exp(-|z|))
    return jnp.minimum(z, 0.0) - jnp.log(1.0 + jnp.exp(-jnp.abs(z)))


# --------------------------------------------------------------------------- #
# Kernel
# --------------------------------------------------------------------------- #
def _focal_dice_kernel(x_ref, t_ref, out_ref,
                       inter_acc, denom_acc, focal_acc,
                       *, m_total, n_inner, n_tiles_total, spatial_split, ragged):
    g = pl.program_id(0)          # parallel axis (row blocks OR spatial halves)
    j = pl.program_id(1)          # inner reduction over spatial tiles
    block_rows, tile_m = x_ref.shape

    @pl.when(j == 0)
    def _():
        inter_acc[...] = jnp.zeros_like(inter_acc)
        denom_acc[...] = jnp.zeros_like(denom_acc)
        focal_acc[...] = jnp.zeros_like(focal_acc)

    # Global spatial-tile index (spatial mode shards tiles over g).
    gj = g * n_inner + j if spatial_split else j

    def accumulate(masked):
        x = x_ref[...].astype(jnp.float32)
        t = t_ref[...].astype(jnp.float32)
        if masked:
            cols = (jax.lax.broadcasted_iota(jnp.int32, (block_rows, tile_m), 1)
                    + gj * tile_m)
            col_mask = cols < m_total
            x = jnp.where(col_mask, x, 0.0)
            t = jnp.where(col_mask, t, 0.0)

        # --- Dice partial row sums (raw logits: sigmoid/softmax off) ---------
        xt = x * t
        inter_acc[...] += jnp.sum(xt, axis=1, keepdims=True)
        denom_acc[...] += jnp.sum(x + t, axis=1, keepdims=True)   # ground_o + pred_o fused

        # --- Sigmoid focal loss (gamma = 2), shared-transcendental form ------
        # Targets are EXACTLY 0/1 (one-hot), so |x*(2t-1)| == |x| and:
        #   u      = x - 2*x*t          (= -x*(2t-1); reuses xt)
        #   e      = exp(-|x|)          (1 EUP exp / element)
        #   L      = log(1+e)           (1 EUP log / element)
        #   bce    = max(u,0) + L       (== BCEWithLogits(x, t), stable)
        #   sig(u) = where(u>=0, 1, e) / (1+e)
        #   focal  = sig(u)^2 * bce
        u = x - 2.0 * xt
        e = jnp.exp(-jnp.abs(x))
        one_plus_e = 1.0 + e
        log_term = jnp.log(one_plus_e)
        inv1pe = pl.reciprocal(one_plus_e)       # EUP slot, not a VALU divide chain
        sig_u = jnp.where(u >= 0.0, 1.0, e) * inv1pe
        focal = sig_u * sig_u * (jnp.maximum(u, 0.0) + log_term)
        if masked:
            # padded cols would otherwise contribute 0.25*log(2) each
            focal = jnp.where(col_mask, focal, 0.0)
        focal_acc[...] += jnp.sum(focal, axis=1, keepdims=True)

    if not ragged:
        accumulate(False)                         # no masking cost anywhere
    else:
        last = n_tiles_total - 1

        @pl.when(gj < last)
        def _():
            accumulate(False)                     # interior tiles: unmasked

        @pl.when(gj == last)
        def _():
            accumulate(True)                      # only the final tile pays the mask

    # --- Emit raw per-row partials once per parallel block --------------------
    # Columns: 0 = intersection, 1 = denominator (sum x + sum t), 2 = focal sum.
    @pl.when(j == n_inner - 1)
    def _():
        col = jax.lax.broadcasted_iota(jnp.int32, (block_rows, 128), 1)
        out_ref[...] = (jnp.where(col == 0, inter_acc[...], 0.0)
                        + jnp.where(col == 1, denom_acc[...], 0.0)
                        + jnp.where(col == 2, focal_acc[...], 0.0))


# --------------------------------------------------------------------------- #
# Tiling plan
# --------------------------------------------------------------------------- #
def _vmem_capacity_bytes():
    try:
        info = pltpu.get_tpu_info()
        cap = getattr(info, "vmem_capacity_bytes", None)
        if cap:
            return int(cap)
    except Exception:
        pass
    return 64 * 1024 * 1024          # conservative (v7x-sized) fallback


def _pick_tile_m(m_total, max_tile_cols, prefer_even_tiles):
    """Pick tile_m (multiple of 128, <= budget).  Preference order:
       spatial mode: even #tiles (2-TC split) > no ragged tile > fewest tiles;
       rows mode   : no ragged tile > fewest tiles."""
    if m_total <= 128:
        return m_total, 1, False      # full-dim block (allowed even if not %128)
    max_tile_cols = max(128, (max_tile_cols // 128) * 128)
    limit = min(max_tile_cols, ((m_total + 127) // 128) * 128)
    best = None
    for tile_m in range(128, limit + 1, 128):
        n_tiles = -(-m_total // tile_m)
        ragged = (m_total % tile_m) != 0
        even = (n_tiles % 2 == 0)
        if prefer_even_tiles:
            score = (not even, ragged, n_tiles, -tile_m)
        else:
            score = (ragged, n_tiles, -tile_m)
        if best is None or score < best[0]:
            best = (score, tile_m, n_tiles, ragged)
    return best[1], best[2], best[3]


def _plan(n_rows, m_total, itemsize_pair):
    vmem_cap = _vmem_capacity_bytes()
    # 32 MiB scoped limit / 24 MiB input-window budget on v7x (64 MiB physical),
    # 64 / 48 MiB on v5e & v6e (128 MiB physical).
    vmem_limit = min(vmem_cap // 2, 64 * 1024 * 1024)
    budget = (vmem_limit * 3) // 4

    if n_rows % 16 == 0:
        mode = "rows"                  # split rows across the two TensorCores
        num_par = 2
        block_rows = n_rows // 2       # multiple of 8 by construction
        prefer_even = False
    else:
        mode = "spatial"               # split SPATIAL tiles across the two TCs
        num_par = 1                    # fixed below once #tiles is known
        block_rows = n_rows            # full row dim -> always layout-legal
        prefer_even = True

    per_col_bytes = 2 * block_rows * itemsize_pair     # double-buffered, both inputs
    max_tile_cols = max(128, budget // max(per_col_bytes, 1))
    tile_m, n_tiles, ragged = _pick_tile_m(m_total, max_tile_cols, prefer_even)

    if mode == "rows":
        n_inner = n_tiles
    else:
        num_par = 2 if (n_tiles >= 2 and n_tiles % 2 == 0) else 1
        n_inner = n_tiles // num_par

    return dict(mode=mode, num_par=num_par, block_rows=block_rows, tile_m=tile_m,
                n_inner=n_inner, n_tiles=n_tiles, ragged=ragged,
                vmem_limit=vmem_limit)


# --------------------------------------------------------------------------- #
# Wrapper
# --------------------------------------------------------------------------- #
def focal_dice_loss(inputs, targets):
    """inputs, targets: NCHW. targets MUST be exactly one-hot 0/1 along C (the
    shared-transcendental focal weight relies on |x*(2t-1)| == |x|; soft or
    label-smoothed targets are not supported)."""
    B, C, H, W = inputs.shape
    assert targets.shape == inputs.shape
    assert C >= 2, "include_background=False needs at least 2 channels"
    N, M = B * C, H * W

    # Free contiguous reshapes — no channel-slice copy; background rows are
    # dropped in the tiny epilogue below. Inputs keep their dtype in HBM.
    x = inputs.reshape(N, M)
    t = targets.reshape(N, M)

    plan = _plan(N, M, x.dtype.itemsize + t.dtype.itemsize)
    G = plan["num_par"]
    R = plan["block_rows"]
    tile_m = plan["tile_m"]
    n_inner = plan["n_inner"]
    spatial_split = plan["mode"] == "spatial"

    if spatial_split:
        in_map = lambda g, j: (0, g * n_inner + j)     # shard spatial tiles over g
    else:
        in_map = lambda g, j: (g, j)                   # shard row blocks over g

    kernel = functools.partial(
        _focal_dice_kernel,
        m_total=M, n_inner=n_inner, n_tiles_total=plan["n_tiles"],
        spatial_split=spatial_split, ragged=plan["ragged"])

    partials = pl.pallas_call(
        kernel,
        out_shape=jax.ShapeDtypeStruct((G, R, 128), jnp.float32),
        grid_spec=pltpu.PrefetchScalarGridSpec(
            num_scalar_prefetch=0,
            grid=(G, n_inner),
            in_specs=[
                pl.BlockSpec((R, tile_m), in_map),
                pl.BlockSpec((R, tile_m), in_map),
            ],
            out_specs=pl.BlockSpec((None, R, 128), lambda g, j: (g, 0, 0)),
            scratch_shapes=[
                pltpu.VMEM((R, 1), jnp.float32),   # intersection per row
                pltpu.VMEM((R, 1), jnp.float32),   # denominator (sum x + sum t)
                pltpu.VMEM((R, 1), jnp.float32),   # focal partial per row
            ],
        ),
        compiler_params=pltpu.CompilerParams(
            dimension_semantics=("parallel", "arbitrary"),
            vmem_limit_bytes=plan["vmem_limit"]),
    )(x, t)

    # ---- Tiny O(N) epilogue in plain XLA: combine partials & finalize -------
    if spatial_split:
        per_row = jnp.sum(partials, axis=0)            # sum the spatial halves
    else:
        per_row = partials.reshape(N, 128)             # row blocks already disjoint
    inter = per_row[:, 0]
    denom = per_row[:, 1]
    focal = per_row[:, 2]

    dice = 1.0 - (2.0 * inter + SMOOTH_NR) / (denom + SMOOTH_DR)
    fg = (jnp.arange(N) % C) != 0                      # include_background=False
    n_fg = B * (C - 1)
    return (jnp.sum(jnp.where(fg, dice, 0.0)) / n_fg
            + jnp.sum(jnp.where(fg, focal, 0.0)) / (n_fg * M))


# --------------------------------------------------------------------------- #
# Reference (unfused MONAI formulation) & test
# --------------------------------------------------------------------------- #
def _reference(inputs, targets):
    x = inputs[:, 1:].astype(jnp.float32)
    t = targets[:, 1:].astype(jnp.float32)
    inter = jnp.sum(x * t, axis=(2, 3))
    ground = jnp.sum(t, axis=(2, 3))
    pred = jnp.sum(x, axis=(2, 3))
    dice = 1.0 - (2.0 * inter + SMOOTH_NR) / (ground + pred + SMOOTH_DR)
    max_val = jnp.maximum(-x, 0.0)
    bce = x - x * t + max_val + jnp.log(jnp.exp(-max_val) + jnp.exp(-x - max_val))
    invprobs = _log_sigmoid(-x * (t * 2.0 - 1.0))
    focal = jnp.exp(invprobs * GAMMA) * bce
    return jnp.mean(dice) + jnp.mean(focal)


def _run_case(key, B, C, H, W):
    k_in, k_tgt = jax.random.split(key)
    inputs = jax.random.normal(k_in, (B, C, H, W), dtype=jnp.float32)
    cls = jax.random.randint(k_tgt, (B, H, W), 0, C)
    # bf16 one-hot targets halve target HBM traffic (values exactly 0/1).
    targets = jax.nn.one_hot(cls, C, axis=1, dtype=jnp.bfloat16)
    out = jax.block_until_ready(focal_dice_loss(inputs, targets))
    ref = _reference(inputs, targets)
    assert jnp.allclose(out, ref, rtol=1e-4, atol=1e-4), (B, C, H, W, out, ref)


if __name__ == "__main__":
    key = jax.random.PRNGKey(0)
    k0, k1, k2 = jax.random.split(key, 3)
    _run_case(k0, 2, 4, 16, 16)   # spatial-split mode (N=8):  G=2 over spatial tiles
    _run_case(k1, 2, 8, 16, 16)   # rows-split mode   (N=16):  G=2 over row blocks
    _run_case(k2, 2, 4, 12, 12)   # ragged spatial tile: masked path only on last tile
    print("KERNEL_OK")
</pallas_src>

<mosaic_0001>
module attributes {stable_mosaic.version = 11 : i64} {
  func.func @_focal_dice_kernel(%arg0: i32, %arg1: i32, %arg2: memref<8x128xf32, #tpu.memory_space<vmem>>, %arg3: memref<8x128xbf16, #tpu.memory_space<vmem>>, %arg4: memref<1x8x128xf32, #tpu.memory_space<vmem>>, %arg5: memref<8x1xf32, #tpu.memory_space<vmem>>, %arg6: memref<8x1xf32, #tpu.memory_space<vmem>>, %arg7: memref<8x1xf32, #tpu.memory_space<vmem>>) attributes {dimension_semantics = [#tpu.dimension_semantics<parallel>, #tpu.dimension_semantics<arbitrary>], iteration_bounds = array<i64: 2, 1>, scalar_prefetch = 0 : i64, scratch_operands = 3 : i64, tpu.core_type = #tpu.core_type<tc>, window_params = [{transform_indices = @transform_0, window_bounds = array<i64: 8, 128>}, {transform_indices = @transform_1, window_bounds = array<i64: 8, 128>}, {transform_indices = @transform_2, window_bounds = array<i64: 1, 8, 128>}]} {
    %c0_i32 = arith.constant 0 : i32
    %0 = arith.cmpi eq, %arg1, %c0_i32 : i32
    %1 = arith.extui %0 : i1 to i32
    %c0_i32_0 = arith.constant 0 : i32
    %2 = arith.cmpi ne, %1, %c0_i32_0 : i32
    scf.if %2 {
      %cst_26 = arith.constant 0.000000e+00 : f32
      %47 = vector.broadcast %cst_26 : f32 to vector<8x1xf32>
      %c0_27 = arith.constant 0 : index
      %c0_28 = arith.constant 0 : index
      %48 = vector.load %arg5[%c0_27, %c0_28] : memref<8x1xf32, #tpu.memory_space<vmem>>, vector<8x1xf32>
      tpu.vector_store %arg5[%c0_27, %c0_28], %47 {strides = array<i32>} : memref<8x1xf32, #tpu.memory_space<vmem>>, vector<8x1xf32>,
      %cst_29 = arith.constant 0.000000e+00 : f32
      %49 = vector.broadcast %cst_29 : f32 to vector<8x1xf32>
      %c0_30 = arith.constant 0 : index
      %c0_31 = arith.constant 0 : index
      %50 = vector.load %arg6[%c0_30, %c0_31] : memref<8x1xf32, #tpu.memory_space<vmem>>, vector<8x1xf32>
      tpu.vector_store %arg6[%c0_30, %c0_31], %49 {strides = array<i32>} : memref<8x1xf32, #tpu.memory_space<vmem>>, vector<8x1xf32>,
      %cst_32 = arith.constant 0.000000e+00 : f32
      %51 = vector.broadcast %cst_32 : f32 to vector<8x1xf32>
      %c0_33 = arith.constant 0 : index
      %c0_34 = arith.constant 0 : index
      %52 = vector.load %arg7[%c0_33, %c0_34] : memref<8x1xf32, #tpu.memory_space<vmem>>, vector<8x1xf32>
      tpu.vector_store %arg7[%c0_33, %c0_34], %51 {strides = array<i32>} : memref<8x1xf32, #tpu.memory_space<vmem>>, vector<8x1xf32>,
    } else {
    }
    %c0 = arith.constant 0 : index
    %c0_1 = arith.constant 0 : index
    %3 = vector.load %arg2[%c0, %c0_1] : memref<8x128xf32, #tpu.memory_space<vmem>>, vector<8x128xf32>
    %c0_2 = arith.constant 0 : index
    %c0_3 = arith.constant 0 : index
    %4 = vector.load %arg3[%c0_2, %c0_3] : memref<8x128xbf16, #tpu.memory_space<vmem>>, vector<8x128xbf16>
    %5 = arith.extf %4 : vector<8x128xbf16> to vector<8x128xf32>
    %6 = arith.mulf %3, %5 : vector<8x128xf32>
    %c0_4 = arith.constant 0 : index
    %c0_5 = arith.constant 0 : index
    %7 = vector.load %arg5[%c0_4, %c0_5] : memref<8x1xf32, #tpu.memory_space<vmem>>, vector<8x1xf32>
    %cst = arith.constant dense<0.000000e+00> : vector<8xf32>
    %8 = vector.multi_reduction <add>, %6, %cst [1] : vector<8x128xf32> to vector<8xf32>
    %9 = vector.shape_cast %8 : vector<8xf32> to vector<8x1xf32>
    %10 = arith.addf %7, %9 : vector<8x1xf32>
    %c0_6 = arith.constant 0 : index
    %c0_7 = arith.constant 0 : index
    %11 = vector.load %arg5[%c0_6, %c0_7] : memref<8x1xf32, #tpu.memory_space<vmem>>, vector<8x1xf32>
    tpu.vector_store %arg5[%c0_6, %c0_7], %10 {strides = array<i32>} : memref<8x1xf32, #tpu.memory_space<vmem>>, vector<8x1xf32>,
    %c0_8 = arith.constant 0 : index
    %c0_9 = arith.constant 0 : index
    %12 = vector.load %arg6[%c0_8, %c0_9] : memref<8x1xf32, #tpu.memory_space<vmem>>, vector<8x1xf32>
    %13 = arith.addf %3, %5 : vector<8x128xf32>
    %cst_10 = arith.constant dense<0.000000e+00> : vector<8xf32>
    %14 = vector.multi_reduction <add>, %13, %cst_10 [1] : vector<8x128xf32> to vector<8xf32>
    %15 = vector.shape_cast %14 : vector<8xf32> to vector<8x1xf32>
    %16 = arith.addf %12, %15 : vector<8x1xf32>
    %c0_11 = arith.constant 0 : index
    %c0_12 = arith.constant 0 : index
    %17 = vector.load %arg6[%c0_11, %c0_12] : memref<8x1xf32, #tpu.memory_space<vmem>>, vector<8x1xf32>
    tpu.vector_store %arg6[%c0_11, %c0_12], %16 {strides = array<i32>} : memref<8x1xf32, #tpu.memory_space<vmem>>, vector<8x1xf32>,
    %cst_13 = arith.constant 2.000000e+00 : f32
    %18 = vector.broadcast %cst_13 : f32 to vector<8x128xf32>
    %19 = arith.mulf %18, %6 : vector<8x128xf32>
    %20 = arith.subf %3, %19 : vector<8x128xf32>
    %21 = math.absf %3 : vector<8x128xf32>
    %cst_14 = arith.constant 0.000000e+00 : f32
    %22 = vector.broadcast %cst_14 : f32 to vector<8x128xf32>
    %23 = arith.subf %22, %21 : vector<8x128xf32>
    %24 = math.exp %23 : vector<8x128xf32>
    %cst_15 = arith.constant 1.000000e+00 : f32
    %25 = vector.broadcast %cst_15 : f32 to vector<8x128xf32>
    %26 = arith.addf %25, %24 : vector<8x128xf32>
    %27 = math.log %26 : vector<8x128xf32>
    %28 = tpu.reciprocal %26 : vector<8x128xf32> -> vector<8x128xf32>
    %cst_16 = arith.constant 0.000000e+00 : f32
    %29 = vector.broadcast %cst_16 : f32 to vector<8x128xf32>
    %30 = arith.cmpf oge, %20, %29 : vector<8x128xf32>
    %cst_17 = arith.constant 1.000000e+00 : f32
    %31 = vector.broadcast %cst_17 : f32 to vector<8x128xf32>
    %32 = arith.select %30, %31, %24 : vector<8x128xi1>, vector<8x128xf32>
    %33 = arith.mulf %32, %28 : vector<8x128xf32>
    %34 = arith.mulf %33, %33 : vector<8x128xf32>
    %cst_18 = arith.constant 0.000000e+00 : f32
    %35 = vector.broadcast %cst_18 : f32 to vector<8x128xf32>
    %36 = arith.maximumf %20, %35 : vector<8x128xf32>
    %37 = arith.addf %36, %27 : vector<8x128xf32>
    %38 = arith.mulf %34, %37 : vector<8x128xf32>
    %c0_19 = arith.constant 0 : index
    %c0_20 = arith.constant 0 : index
    %39 = vector.load %arg7[%c0_19, %c0_20] : memref<8x1xf32, #tpu.memory_space<vmem>>, vector<8x1xf32>
    %cst_21 = arith.constant dense<0.000000e+00> : vector<8xf32>
    %40 = vector.multi_reduction <add>, %38, %cst_21 [1] : vector<8x128xf32> to vector<8xf32>
    %41 = vector.shape_cast %40 : vector<8xf32> to vector<8x1xf32>
    %42 = arith.addf %39, %41 : vector<8x1xf32>
    %c0_22 = arith.constant 0 : index
    %c0_23 = arith.constant 0 : index
    %43 = vector.load %arg7[%c0_22, %c0_23] : memref<8x1xf32, #tpu.memory_space<vmem>>, vector<8x1xf32>
    tpu.vector_store %arg7[%c0_22, %c0_23], %42 {strides = array<i32>} : memref<8x1xf32, #tpu.memory_space<vmem>>, vector<8x1xf32>,
    %c0_i32_24 = arith.constant 0 : i32
    %44 = arith.cmpi eq, %arg1, %c0_i32_24 : i32
    %45 = arith.extui %44 : i1 to i32
    %c0_i32_25 = arith.constant 0 : i32
    %46 = arith.cmpi ne, %45, %c0_i32_25 : i32
    scf.if %46 {
      %47 = tpu.iota {dimensions = array<i32: 1>} : vector<8x128xi32>
      %c0_i32_26 = arith.constant 0 : i32
      %48 = vector.broadcast %c0_i32_26 : i32 to vector<8x128xi32>
      %49 = arith.cmpi eq, %47, %48 : vector<8x128xi32>
      %c0_27 = arith.constant 0 : index
      %c0_28 = arith.constant 0 : index
      %50 = vector.load %arg5[%c0_27, %c0_28] : memref<8x1xf32, #tpu.memory_space<vmem>>, vector<8x1xf32>
      %cst_29 = arith.constant 0.000000e+00 : f32
      %51 = vector.shape_cast %50 : vector<8x1xf32> to vector<8x1xf32>
      %52 = vector.broadcast %51 : vector<8x1xf32> to vector<8x128xf32>
      %53 = vector.broadcast %cst_29 : f32 to vector<8x128xf32>
      %54 = arith.select %49, %52, %53 : vector<8x128xi1>, vector<8x128xf32>
      %c1_i32 = arith.constant 1 : i32
      %55 = vector.broadcast %c1_i32 : i32 to vector<8x128xi32>
      %56 = arith.cmpi eq, %47, %55 : vector<8x128xi32>
      %c0_30 = arith.constant 0 : index
      %c0_31 = arith.constant 0 : index
      %57 = vector.load %arg6[%c0_30, %c0_31] : memref<8x1xf32, #tpu.memory_space<vmem>>, vector<8x1xf32>
      %cst_32 = arith.constant 0.000000e+00 : f32
      %58 = vector.shape_cast %57 : vector<8x1xf32> to vector<8x1xf32>
      %59 = vector.broadcast %58 : vector<8x1xf32> to vector<8x128xf32>
      %60 = vector.broadcast %cst_32 : f32 to vector<8x128xf32>
      %61 = arith.select %56, %59, %60 : vector<8x128xi1>, vector<8x128xf32>
      %62 = arith.addf %54, %61 : vector<8x128xf32>
      %c2_i32 = arith.constant 2 : i32
      %63 = vector.broadcast %c2_i32 : i32 to vector<8x128xi32>
      %64 = arith.cmpi eq, %47, %63 : vector<8x128xi32>
      %c0_33 = arith.constant 0 : index
      %c0_34 = arith.constant 0 : index
      %65 = vector.load %arg7[%c0_33, %c0_34] : memref<8x1xf32, #tpu.memory_space<vmem>>, vector<8x1xf32>
      %cst_35 = arith.constant 0.000000e+00 : f32
      %66 = vector.shape_cast %65 : vector<8x1xf32> to vector<8x1xf32>
      %67 = vector.broadcast %66 : vector<8x1xf32> to vector<8x128xf32>
      %68 = vector.broadcast %cst_35 : f32 to vector<8x128xf32>
      %69 = arith.select %64, %67, %68 : vector<8x128xi1>, vector<8x128xf32>
      %70 = arith.addf %62, %69 : vector<8x128xf32>
      %c0_36 = arith.constant 0 : index
      %c0_37 = arith.constant 0 : index
      %c0_38 = arith.constant 0 : index
      %71 = vector.load %arg4[%c0_36, %c0_37, %c0_38] : memref<1x8x128xf32, #tpu.memory_space<vmem>>, vector<1x8x128xf32>
      %72 = vector.shape_cast %71 : vector<1x8x128xf32> to vector<8x128xf32>
      %73 = vector.shape_cast %70 : vector<8x128xf32> to vector<1x8x128xf32>
      tpu.vector_store %arg4[%c0_36, %c0_37, %c0_38], %73 {strides = array<i32>} : memref<1x8x128xf32, #tpu.memory_space<vmem>>, vector<1x8x128xf32>,
    } else {
    }
    return
  }
  func.func @transform_0(%arg0: i32, %arg1: i32) -> (i32, i32) {
    %c1_i32 = arith.constant 1 : i32
    %0 = arith.muli %arg0, %c1_i32 : i32
    %1 = arith.addi %0, %arg1 : i32
    %c0_i32 = arith.constant 0 : i32
    %c0_i32_0 = arith.constant 0 : i32
    return %c0_i32, %1 : i32, i32
  }
  func.func @transform_1(%arg0: i32, %arg1: i32) -> (i32, i32) {
    %c1_i32 = arith.constant 1 : i32
    %0 = arith.muli %arg0, %c1_i32 : i32
    %1 = arith.addi %0, %arg1 : i32
    %c0_i32 = arith.constant 0 : i32
    %c0_i32_0 = arith.constant 0 : i32
    return %c0_i32, %1 : i32, i32
  }
  func.func @transform_2(%arg0: i32, %arg1: i32) -> (i32, i32, i32) {
    %c0_i32 = arith.constant 0 : i32
    %c0_i32_0 = arith.constant 0 : i32
    %c0_i32_1 = arith.constant 0 : i32
    return %arg0, %c0_i32, %c0_i32_0 : i32, i32, i32
  }
}

</mosaic_0001>

<bundles_post_ra>
// kernel: tpu_custom_call.1
= control target key start
LH: loop header
LB: loop body
LE: loop exit
PB: predicated region body
PF: predicated region fallthrough
CT: control target
= control target key end

     0   :  { %7 = vsyncpa [#allocation6], 0  ;;  %s897_s0 = inlined_call_operand.hbm [shape: f32[8,256], index: 0, kind: input, shape index: {}]   ;;  %s898_s1 = inlined_call_operand.hbm [shape: bf16[8,256], index: 1, kind: input, shape index: {}]   ;;  %s899_s2 = inlined_call_operand.hbm [shape: f32[2,8,128], index: 2, kind: output, shape index: {}]  }
   0x1   :  { %9 = vsyncpa [#allocation6 + $0x1], 0 }
   0x2   :  { %10 = vsyncpa [#allocation9], 0 }
   0x3   :  { %12 = vsyncpa [#allocation9 + $0x1], 0 }
   0x4   :  { %13 = vsyncpa [#allocation7], 0 }
   0x5   :  { %15 = vsyncpa [#allocation7 + $0x1], 0  ;;  %s672_s9 = smov 0   ;;  %s674_s10 = smov 0  }
   0x6   :  { %s676_s11 = smov 0   ;;  %s678_s12 = smov 0  }
   0x7   :  { %s680_s13 = smov 0   ;;  %s682_s14 = smov 0  }
   0x8 LB: > { %s411_s15 = sadd.s32 4294967295, %s650_s14   ;;  %s412_s16 = sadd.s32 4294967294, %s650_s14   ;;  %s650_s14 = sphi %s682_s14, %s21_s14   ;;  %s646_s13 = sphi %s680_s13, %s919_s13   ;;  %s642_s12 = sphi %s678_s12, %s918_s12   ;;  %s638_s11 = sphi %s676_s11, %s917_s11   ;;  %s634_s10 = sphi %s674_s10, %s916_s10   ;;  %s630_s9 = sphi %s672_s9, %s915_s9  }
   0x9   : > { %s33_s17 = sadd.s32 1, %s646_s13  ;;  %s42_s18 = sadd.s32 1, %s638_s11 }
   0xa   : > { %p35_p0 = scmp.ge.s32.totalorder %s33_s17, 2  ;;  %p49_p1 = scmp.ne.s32.totalorder %s638_s11, %s634_s10 }
   0xb   : > { %p50_p2 = scmp.eq.s32.totalorder %s650_s14, 0  ;;  %p55_p3 = scmp.ne.s32.totalorder %s634_s10, %s630_s9 }
   0xc   : > { %s921_s17 = smov (%p35_p0, %s33_s17), 0  ;;  %p56_p5 = scmp.eq.s32.totalorder %s411_s15, 0 }
   0xd   : > { %p713_p4 = por %p50_p2, %p49_p1  ;;  %s39_s20 = ssub.s32 %s646_s13, %s921_s17 }
   0xe   : > { %p107_p6 = scmp.eq.s32.totalorder %s411_s15, 1  ;;  %p40_p7 = scmp.eq.s32.totalorder %s39_s20, 0 }
   0xf   : > { %p719_p8 = por %p56_p5, %p55_p3  ;;  %p113_p10 = scmp.eq.s32.totalorder %s412_s16, 1 }
  0x10   : > { %p723_p9 = por %p107_p6, %p49_p1  ;;  %p444_p13 = scmp.lt.s32.totalorder %s650_s14, 2 }
  0x11   : > { %s903_s21 = scalar_select %p719_p8, 1, 0 }
  0x12   : > { %s904_s22 = scalar_select %p723_p9, 1, 0 }
  0x13   : > { %s728_s23 = scalar_select %p40_p7, %s638_s11, %s42_s18  }
  0x14   : > { %p730_p11 = por %p113_p10, %p55_p3  ;;  %s737_s25 = sand.u32 1, %s638_s11  }
  0x15   : > { %s415_s26 = sshll.u32 %s737_s25, 3  ;;  %s416_s27 = sshll.u32 %s646_s13, 7 }
  0x16   : > { %s905_s24 = scalar_select %p730_p11, 1, 0 }
  0x17   : > { %s744_s30 = scalar_lea.hbm %s897_s0, %s416_s27  ;;  %s137_s3 = scalar_lea.vmem [#allocation5], %s415_s26 }
  0x18   : > { %s145_s4 = sshll.u32 %s137_s3, 4  ;;  %p750_p0 = pnand %p444_p13, %p713_p4  ;;  %s746_s4 = int_to_ptr.vmem [resolvable:$true] %s145_s4 }
  0x19   : > { %s134_s6 = scalar_lea.sflag [#allocation6], %s737_s25  ;;  %s504_s7 = scalar_lea.hbm %s744_s30, 128 }
  0x1a   : > { %p505_p3 = scmp.ne.s32.totalorder %s744_s30, %s504_s7  ;;  %p506_p5 = pneg %p750_p0 }
  0x1b   : > { %s509_s16 = scalar_lea.hbm %s897_s0, 256  ;;  %p510_p4 = scmp.lt.u32.totalorder %s744_s30, %s897_s0 }
  0x1c   : > { %p507_p6 = pnand %p506_p5, %p505_p3  ;;  %p511_p10 = scmp.lt.u32.totalorder %s509_s16, %s504_s7 }
  0x1d   : > { %p513_p12 = scmp.lt.u32.totalorder %s504_s7, %s744_s30 }
  0x1e   : > { %p508_p7 = pneg %p507_p6  ;;  %p512_p13 = por %p511_p10, %p510_p4 }
  0x20   : > { %p514_p1 = por %p513_p12, %p512_p13 }
  0x22   : > { %p515_p2 = pnand %p514_p1, %p508_p7 }
  0x24   : > { %518 = shalt.err (!%p515_p2)
}
  0x25   : > { %s519_s20 = scalar_lea.vmem %s746_s4, 128  ;;  %s652_s26 = smov [#allocation5]  }
  0x26   : > { %p520_p3 = scmp.ne.s32.totalorder %s746_s4, %s519_s20  ;;  %s524_s27 = sshll.u32 %s652_s26, 4  ;;  %s525_s27 = int_to_ptr.vmem [resolvable:$false] %s524_s27 }
  0x27   : > { %s526_s28 = scalar_lea.vmem %s525_s27, 256  ;;  %p527_p9 = scmp.lt.s32.totalorder %s746_s4, %s525_s27 }
  0x28   : > { %p522_p6 = pnand %p520_p3, %p506_p5  ;;  %p528_p4 = scmp.lt.s32.totalorder %s526_s28, %s519_s20 }
  0x2a   : > { %p523_p11 = pneg %p522_p6  ;;  %p529_p10 = por %p528_p4, %p527_p9 }
  0x2c   : > { %p530_p12 = pnand %p529_p10, %p523_p11 }
  0x2e   : > { %533 = shalt.err (!%p530_p12)
}
  0x2f   : > { %436 = dma.hbm_to_vmem [thread:$0]  (!%p750_p0), %s744_s30, 128, %s746_s4, %s134_s6  }
  0x30   : > { %p907_p1 = scmp.lt.s32.totalorder %s650_s14, 3  ;;  %p908_p2 = scmp.ge.s32.totalorder %s650_s14, 1 }
  0x31   : > { %s417_s3 = sshll.u32 %s737_s25, 2  ;;  %s418_s7 = sshll.u32 %s646_s13, 6 }
  0x32   : > { %p786_p7 = pnand %p908_p2, %p907_p1  ;;  %s795_s16 = scalar_lea.hbm %s898_s1, %s418_s7 }
  0x33   : > { %s156_s18 = scalar_lea.vmem [#allocation8], %s417_s3  ;;  %s153_s30 = scalar_lea.sflag [#allocation9], %s737_s25 }
  0x34   : > { %s909_s29 = scalar_select %p786_p7, 1, 0 }
  0x35   : > { %s164_s19 = sshll.u32 %s156_s18, 4  ;;  %s534_s4 = scalar_lea.hbm %s795_s16, 64  ;;  %s165_s19 = int_to_ptr.vmem [resolvable:$true] %s164_s19 }
  0x36   : > { %p535_p9 = scmp.ne.s32.totalorder %s795_s16, %s534_s4  ;;  %s539_s26 = scalar_lea.hbm %s898_s1, 128 }
  0x37   : > { %p540_p3 = scmp.lt.u32.totalorder %s795_s16, %s898_s1  ;;  %p541_p6 = scmp.lt.u32.totalorder %s539_s26, %s534_s4 }
  0x38   : > { %p537_p11 = pnand %p535_p9, %p506_p5  ;;  %p543_p10 = scmp.lt.u32.totalorder %s534_s4, %s795_s16 }
  0x39   : > { %p542_p4 = por %p541_p6, %p540_p3 }
  0x3a   : > { %p538_p13 = pneg %p537_p11 }
  0x3b   : > { %p544_p12 = por %p543_p10, %p542_p4 }
  0x3d   : > { %p545_p1 = pnand %p544_p12, %p538_p13 }
  0x3f   : > { %548 = shalt.err (!%p545_p1)
}
  0x40   : > { %s549_s25 = scalar_lea.vmem %s165_s19, 64  ;;  %s653_s3 = smov [#allocation8]  }
  0x41   : > { %p550_p2 = scmp.ne.s32.totalorder %s165_s19, %s549_s25  ;;  %s554_s7 = sshll.u32 %s653_s3, 4  ;;  %s555_s7 = int_to_ptr.vmem [resolvable:$false] %s554_s7 }
  0x42   : > { %s556_s8 = scalar_lea.vmem %s555_s7, 128  ;;  %p557_p8 = scmp.lt.s32.totalorder %s165_s19, %s555_s7 }
  0x43   : > { %p552_p9 = pnand %p550_p2, %p506_p5  ;;  %p558_p7 = scmp.lt.s32.totalorder %s556_s8, %s549_s25 }
  0x45   : > { %p553_p11 = pneg %p552_p9  ;;  %p559_p3 = por %p558_p7, %p557_p8 }
  0x47   : > { %p560_p6 = pnand %p559_p3, %p553_p11 }
  0x49   : > { %563 = shalt.err (!%p560_p6)
}
  0x4a   : > { %439 = dma.hbm_to_vmem [thread:$0]  (!%p750_p0), %s795_s16, 64, %s165_s19, %s153_s30  }
  0x4b   : > { %p910_p13 = scmp.ne.s32.totalorder %s909_s29, 0 }
  0x4c   : > { %s820_s15 = sand.u32 (!%p910_p13), 1, %s634_s10   ;;  %p911_p8 = scmp.ne.s32.totalorder (!%p910_p13), %s903_s21, 0 }
  0x4d   : > { %173 = sbr.rel (%p910_p13) target bundleno = 423 (0x1a7), region = 28  ;;  %s420_s18 = sshll.u32 (!%p910_p13), %s820_s15, 3 }
  0x4e   : > { %s176_s4 = scalar_lea.sflag (!%p910_p13), [#allocation6], %s820_s15  ;;  %s179_s6 = scalar_lea.vmem (!%p910_p13), [#allocation5], %s420_s18 }
  0x54   : > { %617 = dma.done.wait (%p911_p8), %s176_s4, 128  }
  0x55   : > { %619 = vsyncadd (%p911_p8), %s176_s4, 4294967168  ;;  %s421_s5 = sshll.u32 %s820_s15, 2  ;;  %s185_s29 = scalar_lea.sflag [#allocation9], %s820_s15 }
  0x56   : > { %s188_s16 = scalar_lea.vmem [#allocation8], %s421_s5 }
  0x57   : > { %621 = dma.done.wait (%p911_p8), %s185_s29, 64  }
  0x58   : > { %623 = vsyncadd (%p911_p8), %s185_s29, 4294967232  ;;  %vm220_vm0 = vcmask 7168   ;;  %v654_v0 = vmov 0.0   ;;  %v224_v1 = vld [vmem:[%s179_s6] sm:$0xff]  ;;  %v225_v2 = vld [vmem:[%s188_s16] sm:$0xf]  ;;  %v265_v35 = vlaneseq }
  0x59   : > { %221 = vst.msk [vmem:[#allocation2] sm:$0xff] %vm220_vm0, %v654_v0  ;;  %222 = vst.msk [vmem:[#allocation3] sm:$0xff] %vm220_vm0, %v654_v0  ;;  %v226_v3 = vunpack.c.l.bf16 %v225_v2  ;;  %v242_v4 = vand.u32 2147483647, %v224_v1  ;;  %v655_v22 = vmov 0   ;;  %s424_s21 = sshll.u32 %s642_s12, 7 }
  0x5a   : > { %223 = vst.msk [vmem:[#allocation4] sm:$0xff] %vm220_vm0, %v654_v0  ;;  %497 = vset.pattern.permute.xlu0 %v655_v22  ;;  %496 = vset.pattern.permute.xlu1 %v655_v22  ;;  %v266_v36 = vand.u32 127, %v265_v35  ;;  %s213_s19 = scalar_lea.vmem [#allocation10], %s420_s18  ;;  %s848_s27 = scalar_lea.hbm %s899_s2, %s424_s21 }
  0x5b   : > { %v227_v5 = vmul.f32 %v226_v3, %v224_v1  ;;  %v243_v6 = vsub.f32 0.0, %v242_v4  ;;  %v235_v8 = vadd.f32 %v226_v3, %v224_v1  ;;  %s308_s30 = sshll.u32 %s213_s19, 4  ;;  %s295_s28 = scalar_lea.sflag [#allocation7], %s820_s15  ;;  %s850_s30 = int_to_ptr.vmem [resolvable:$true] %s308_s30 }
  0x5c   : > { %vm275_vm2 = vcmp.eq.s32.totalorder %v266_v36, 1  ;;  %vm267_vm3 = vcmp.eq.s32.totalorder %v266_v36, 0  ;;  %vm284_vm4 = vcmp.eq.s32.totalorder %v266_v36, 2  ;;  %s564_s12 = scalar_lea.vmem %s850_s30, 128  ;;  %p912_p5 = scmp.ne.s32.totalorder %s904_s22, 0 }
  0x5d   : > { %v244_v7 = vmul.f32 1.442695, %v243_v6  ;;  %229 = vadd.xlane.f32.xlu0 %v227_v5  ;;  %v240_v10 = vmul.f32 2.0, %v227_v5  ;;  %p565_p0 = scmp.ne.s32.totalorder %s850_s30, %s564_s12  ;;  %s656_s25 = smov [#allocation10]  }
  0x5e   : > { %s568_s3 = sshll.u32 %s656_s25, 4  ;;  %s569_s3 = int_to_ptr.vmem [resolvable:$false] %s568_s3 }
  0x5f   : > { %498 = vpow2.f32 %v244_v7  ;;  %v241_v12 = vsub.f32 %v224_v1, %v240_v10  ;;  %p566_p7 = pnand %p565_p0, %p912_p5  ;;  %s570_s7 = scalar_lea.vmem %s569_s3, 256 }
  0x60   : > { %v228_v23 = vld [vmem:[#allocation2] sm:$0xff]  ;;  %v234_v26 = vld [vmem:[#allocation3] sm:$0xff]  ;;  %p571_p10 = scmp.lt.s32.totalorder %s850_s30, %s569_s3  ;;  %p572_p12 = scmp.lt.s32.totalorder %s570_s7, %s564_s12 }
  0x61   : > { %236 = vadd.xlane.f32.xlu0 %v235_v8  ;;  %vm250_vm1 = vcmp.ge.f32.partialorder %v241_v12, 0.0  ;;  %v254_v14 = vmax.f32 %v241_v12, 0.0  ;;  %v257_v31 = vld [vmem:[#allocation4] sm:$0xff]  ;;  %p567_p4 = pneg %p566_p7 }
  0x62   : > { %p573_p1 = por %p572_p12, %p571_p10 }
  0x64   : > { %p574_p2 = pnand %p573_p1, %p567_p4 }
  0x69   : > { %v499_v9 = vpop.eup %498 }
  0x6a   : > { %v246_v11 = vadd.f32 1.0, %v499_v9  ;;  %v251_v13 = vsel %vm250_vm1, 1.0, %v499_v9 }
  0x6c   : > { %500 = vlog2.f32 %v246_v11 }
  0x6d   : > { %502 = vrcp.f32 %v246_v11 }
  0x76   : > { %v501_v15 = vpop.eup %500 }
  0x77   : > { %v503_v16 = vpop.eup %502  ;;  %v248_v17 = vmul.f32 0.6931472, %v501_v15 }
  0x78   : > { %v252_v18 = vmul.f32 %v503_v16, %v251_v13 }
  0x79   : > { %v255_v19 = vadd.f32 %v254_v14, %v248_v17 }
  0x7a   : > { %v253_v20 = vmul.f32 %v252_v18, %v252_v18 }
  0x7c   : > { %v256_v21 = vmul.f32 %v255_v19, %v253_v20 }
  0x7e   : > { %258 = vadd.xlane.f32.xlu1 %v256_v21 }
  0xea   : > { %v230_v24 = vpop.xlane.xlu0 %229 }
  0xeb   : > { %v231_v25 = vadd.f32 %v230_v24, %v228_v23 }
  0xed   : > { %233 = vst.msk [vmem:[#allocation2] sm:$0xff] %vm220_vm0, %v231_v25 }
  0xee   : > { %v237_v27 = vpop.xlane.xlu0 %236 }
  0xef   : > { %v238_v28 = vadd.f32 %v237_v27, %v234_v26 }
  0xf1   : > { %239 = vst.msk [vmem:[#allocation3] sm:$0xff] %vm220_vm0, %v238_v28 }
  0xf4   : > { %v268_v29 = vld [vmem:[#allocation2] sm:$0xff] }
  0xf5   : > { %271 = vperm.xlu1 %496, %v268_v29  }
  0xf8   : > { %v276_v30 = vld [vmem:[#allocation3] sm:$0xff] }
  0xf9   : > { %279 = vperm.xlu0 %497, %v276_v30  }
 0x10b   : > { %v259_v32 = vpop.xlane.xlu1 %258 }
 0x10c   : > { %v260_v33 = vadd.f32 %v259_v32, %v257_v31 }
 0x10e   : > { %261 = vst.msk [vmem:[#allocation4] sm:$0xff] %vm220_vm0, %v260_v33 }
 0x115   : > { %v285_v34 = vld [vmem:[#allocation4] sm:$0xff] }
 0x116   : > { %288 = vperm.xlu1 %496, %v285_v34  }
 0x174   : > { %v272_v38 = vpop.permute.xlu1 %271 }
 0x175   : > { %v274_v40 = vsel %vm267_vm3, %v272_v38, 0.0 }
 0x178   : > { %v280_v37 = vpop.permute.xlu0 %279 }
 0x179   : > { %v282_v39 = vsel %vm275_vm2, %v280_v37, 0.0 }
 0x17a   : > { %v283_v41 = vadd.f32 %v282_v39, %v274_v40 }
 0x195   : > { %v289_v42 = vpop.permute.xlu1 %288 }
 0x196   : > { %v291_v43 = vsel %vm284_vm4, %v289_v42, 0.0 }
 0x197   : > { %v292_v44 = vadd.f32 %v291_v43, %v283_v41 }
 0x199   : > { %293 = vst [vmem:[%s213_s19] sm:$0xff] %v292_v44 }
 0x19a   : > { %577 = shalt.err (!%p574_p2)
}
 0x19b   : > { %s578_s8 = scalar_lea.hbm %s848_s27, 128  ;;  %s582_s4 = scalar_lea.hbm %s899_s2, 256 }
 0x19c   : > { %p579_p9 = scmp.ne.s32.totalorder %s848_s27, %s578_s8  ;;  %p583_p6 = scmp.lt.u32.totalorder %s848_s27, %s899_s2 }
 0x19d   : > { %p584_p13 = scmp.lt.u32.totalorder %s582_s4, %s578_s8  ;;  %p586_p0 = scmp.lt.u32.totalorder %s578_s8, %s848_s27 }
 0x19e   : > { %p580_p11 = pnand %p579_p9, %p912_p5 }
 0x19f   : > { %p585_p8 = por %p584_p13, %p583_p6 }
 0x1a0   : > { %p581_p3 = pneg %p580_p11 }
 0x1a1   : > { %p587_p7 = por %p586_p0, %p585_p8 }
 0x1a3   : > { %p588_p4 = pnand %p587_p7, %p581_p3 }
 0x1a5   : > { %591 = shalt.err (!%p588_p4)
}
 0x1a6   : > { %431 = dma.vmem_to_hbm [thread:$0]  (%p912_p5), %s850_s30, 128, %s848_s27, %s295_s28  }
 0x1a7 PF: > { %s320_s29 = sand.u32 1, %s630_s9   ;;  %p913_p10 = scmp.ne.s32.totalorder %s905_s24, 0 }
 0x1a8   : > { %p914_p12 = scmp.ge.s32.totalorder %s650_s14, 2  ;;  %s321_s16 = scalar_lea.sflag [#allocation7], %s320_s29 }
 0x1aa   : > { %p441_p1 = pnand %p914_p12, %p913_p10 }
 0x1ac   : > { %625 = dma.done.wait (!%p441_p1), %s321_s16, 128  }
 0x1ad   : > { %627 = vsyncadd (!%p441_p1), %s321_s16, 4294967168  ;;  %s21_s14 = sadd.s32 1, %s650_s14   ;;  %s915_s9 = smov %s634_s10 }
 0x1ae   : > { %p18_p2 = scmp.ge.s32.totalorder %s21_s14, 4   ;;  %s916_s10 = smov %s638_s11 }
 0x1af   : > { %s917_s11 = smov %s728_s23  ;;  %s918_s12 = smov %s646_s13 }
 0x1b0   : > { %s919_s13 = smov %s921_s17  ;;  %20 = sbr.rel (!%p18_p2) target bundleno = 8 (0x8), region = 94 }
 0x1b7   :  { %326 = vsyncpa [#allocation6], 1 }
 0x1b8   :  { %328 = vsyncpa [#allocation6 + $0x1], 1 }
 0x1b9   :  { %329 = vsyncpa [#allocation9], 1 }
 0x1ba   :  { %331 = vsyncpa [#allocation9 + $0x1], 1 }
 0x1bb   :  { %332 = vsyncpa [#allocation7], 1 }
 0x1bc   :  { %334 = vsyncpa [#allocation7 + $0x1], 1 }

</bundles_post_ra>
